<compile_context>
chip_gen: v6e
topology: v6e:2x2x1
jax: 0.10.0
libtpu: 0.0.40
codegen_flags: <defaults>
</compile_context>

<pallas_src>
import math

import jax
import jax.numpy as jnp
from jax import lax
from jax.experimental import pallas as pl
from jax.experimental.pallas import tpu as pltpu

EPS = 1e-5          # PyTorch nn.LayerNorm default
_MAX_TILE_ROWS = 512
_LANES = 128


def _hw_info():
    """(vmem_capacity_bytes, num_tensorcores) with conservative fallbacks."""
    vmem = 64 * 1024 * 1024   # conservative default: v7x has 64 MiB per TC
    cores = 1
    try:
        info = pltpu.get_tpu_info()
        v = getattr(info, "vmem_capacity_bytes", None)
        if v:
            vmem = int(v)
        for name in ("num_cores", "num_tensorcores", "tensorcores_per_chip",
                     "core_count"):
            c = getattr(info, name, None)
            if isinstance(c, int) and c > 0:
                cores = c
                break
    except Exception:
        pass
    if cores == 1:
        try:
            c = getattr(jax.devices()[0], "num_cores", None)
            if isinstance(c, int) and c > 0:
                cores = c
        except Exception:
            pass
    return vmem, cores


def _sublane_multiple(dtype) -> int:
    # f32 packs 8 rows per vreg, bf16 16, int8/fp8 32.
    return max(8, 32 // jnp.dtype(dtype).itemsize)


def _round_up(v: int, m: int) -> int:
    return ((v + m - 1) // m) * m


def _pick_tile_rows(rows: int, d_model: int, dtype, num_tc: int,
                    vmem_capacity: int) -> int:
    sub = _sublane_multiple(dtype)
    if rows <= sub:
        return rows  # single full-extent block: always a legal block shape
    itemsize = jnp.dtype(dtype).itemsize
    # Double-buffered in + out (4 * itemsize) plus ~3 f32 temporaries (+16).
    bytes_per_row = d_model * (4 * itemsize + 16)
    budget = vmem_capacity // 4
    tr = max(1, budget // max(bytes_per_row, 1))
    tr = min(tr, _MAX_TILE_ROWS, rows)
    tr = max(sub, (tr // sub) * sub)  # sublane-aligned
    if num_tc > 1:
        # Megacore (v7x): aim for >= 4 grid steps per TensorCore so the
        # auto-pipeline has iterations to hide the block DMAs behind.
        min_steps = 4 * num_tc
        cap = _round_up(max(1, -(-rows // min_steps)), sub)
        tr = max(sub, min(tr, cap))
    return min(tr, rows)


def _layernorm_kernel(x_ref, g_ref, b_ref, o_ref):
    """General path (d_model >= 128 or no clean lane packing)."""
    x = x_ref[...].astype(jnp.float32)
    inv_d = 1.0 / x.shape[-1]
    # Fused sum / sum-of-squares: one pass over x.
    # TODO(synk): if XLU/VALU-bound on bf16 (v6e/v7x), move these reductions
    # to the MXU like the packed path does.
    s1 = jnp.sum(x, axis=-1, keepdims=True)
    s2 = jnp.sum(x * x, axis=-1, keepdims=True)
    mean = s1 * inv_d
    var = jnp.maximum(s2 * inv_d - mean * mean, 0.0)  # biased var, like PyTorch
    inv = lax.rsqrt(var + EPS)
    y = (x - mean) * inv * g_ref[...].astype(jnp.float32) \
        + b_ref[...].astype(jnp.float32)
    o_ref[...] = y.astype(o_ref.dtype)


def _layernorm_packed_kernel(x_ref, g_ref, b_ref, m_ref, o_ref):
    """Lane-dense path for d_model < 128: g = 128//d rows folded into lanes.

    m_ref is a (g*d, g*d) block-diagonal ones/d matrix, so x @ m yields the
    per-segment (i.e. per original row) mean already broadcast to every lane
    of its segment.  The reductions run on the idle MXU and all loads/stores
    are full 128-lane (no masked partial stores).
    """
    x = x_ref[...].astype(jnp.float32)          # (tr, g*d), g*d == 128
    m = m_ref[...]                              # (g*d, g*d), f32
    mean = jnp.dot(x, m, precision=lax.Precision.HIGHEST,
                   preferred_element_type=jnp.float32)
    ex2 = jnp.dot(x * x, m, precision=lax.Precision.HIGHEST,
                  preferred_element_type=jnp.float32)
    var = jnp.maximum(ex2 - mean * mean, 0.0)
    inv = lax.rsqrt(var + EPS)
    y = (x - mean) * inv * g_ref[...].astype(jnp.float32) \
        + b_ref[...].astype(jnp.float32)
    o_ref[...] = y.astype(o_ref.dtype)


def layer_norm(x, gamma, beta, *, tile_rows=None):
    """LayerNorm over the last axis of x, matching torch nn.LayerNorm(d_model)."""
    orig_shape = x.shape
    d_model = orig_shape[-1]
    rows = math.prod(orig_shape[:-1]) if len(orig_shape) > 1 else 1

    vmem_capacity, num_tc = _hw_info()
    vmem_limit = int(0.65 * vmem_capacity)

    # Lane-dense repack for small d_model: fold g rows into the 128-lane axis.
    g = _LANES // d_model if (0 < d_model < _LANES and _LANES % d_model == 0) else 1
    packed = (g > 1) and (rows % g == 0) and (rows >= g)

    gamma = jnp.asarray(gamma)
    beta = jnp.asarray(beta)

    if packed:
        work_rows = rows // g
        work_d = g * d_model                    # == 128 lanes
        x2 = x.reshape(work_rows, work_d)
        g2 = jnp.tile(gamma.reshape(1, d_model), (1, g))
        b2 = jnp.tile(beta.reshape(1, d_model), (1, g))
        seg = jnp.arange(work_d, dtype=jnp.int32) // d_model
        mmat = (seg[:, None] == seg[None, :]).astype(jnp.float32) / float(d_model)
    else:
        work_rows, work_d = rows, d_model
        x2 = x.reshape(work_rows, work_d)
        g2 = gamma.reshape(1, d_model)
        b2 = beta.reshape(1, d_model)
        mmat = None

    sub = _sublane_multiple(x.dtype)
    if tile_rows is not None:
        tr = max(1, min(int(tile_rows), work_rows))
        if tr < work_rows:
            # Not the full extent -> must respect the (8,128) block rule.
            tr = max(sub, (tr // sub) * sub)
            tr = min(tr, work_rows)
    else:
        tr = _pick_tile_rows(work_rows, work_d, x.dtype, num_tc, vmem_capacity)

    grid = (pl.cdiv(work_rows, tr),)
    # Edge block: Pallas pads the last block; padded garbage rows flow through
    # rsqrt (possibly producing inf/NaN there) but the math is strictly
    # per-row and out-of-range rows are never written back -> harmless.

    row_spec = pl.BlockSpec((tr, work_d), lambda i: (i, 0))
    vec_spec = pl.BlockSpec((1, work_d), lambda i: (0, 0))

    compiler_params = pltpu.CompilerParams(
        dimension_semantics=("parallel",),
        vmem_limit_bytes=vmem_limit,
    )

    if packed:
        out = pl.pallas_call(
            _layernorm_packed_kernel,
            out_shape=jax.ShapeDtypeStruct((work_rows, work_d), x.dtype),
            grid_spec=pltpu.PrefetchScalarGridSpec(
                num_scalar_prefetch=0,
                grid=grid,
                in_specs=[
                    row_spec,
                    vec_spec,
                    vec_spec,
                    pl.BlockSpec((work_d, work_d), lambda i: (0, 0)),
                ],
                out_specs=row_spec,
            ),
            compiler_params=compiler_params,
        )(x2, g2, b2, mmat)
    else:
        out = pl.pallas_call(
            _layernorm_kernel,
            out_shape=jax.ShapeDtypeStruct((work_rows, work_d), x.dtype),
            grid_spec=pltpu.PrefetchScalarGridSpec(
                num_scalar_prefetch=0,
                grid=grid,
                in_specs=[row_spec, vec_spec, vec_spec],
                out_specs=row_spec,
            ),
            compiler_params=compiler_params,
        )(x2, g2, b2)

    return out.reshape(orig_shape)


def _reference(x, gamma, beta):
    mean = jnp.mean(x, axis=-1, keepdims=True)
    var = jnp.mean((x - mean) ** 2, axis=-1, keepdims=True)
    return (x - mean) / jnp.sqrt(var + EPS) * gamma + beta


if __name__ == "__main__":
    # Module: LayerNormalization(d_model=32) applied to (batch=2, seq=8, d_model=32)
    d_model = 32
    batch, seq = 2, 8

    key = jax.random.PRNGKey(0)
    x = jax.random.normal(key, (batch, seq, d_model), dtype=jnp.float32)

    # nn.LayerNorm default parameter init: weight = ones, bias = zeros
    gamma = jnp.ones((d_model,), dtype=jnp.float32)
    beta = jnp.zeros((d_model,), dtype=jnp.float32)

    y = layer_norm(x, gamma, beta)               # exercises the lane-dense packed path
    jax.block_until_ready(y)
    assert jnp.allclose(y, _reference(x, gamma, beta), atol=1e-5, rtol=1e-5), \
        "packed path mismatch vs reference"

    # Also exercise the general (d_model >= 128) path at a small shape.
    d_big = 256
    k1, k2, k3 = jax.random.split(jax.random.PRNGKey(0), 3)
    xb = jax.random.normal(k1, (batch, seq, d_big), dtype=jnp.float32)
    gb = 1.0 + 0.1 * jax.random.normal(k2, (d_big,), dtype=jnp.float32)
    bb = 0.1 * jax.random.normal(k3, (d_big,), dtype=jnp.float32)
    yb = layer_norm(xb, gb, bb)
    jax.block_until_ready(yb)
    assert jnp.allclose(yb, _reference(xb, gb, bb), atol=2e-5, rtol=1e-5), \
        "general path mismatch vs reference"

    print("KERNEL_OK")
</pallas_src>

<mosaic_0001>
module attributes {stable_mosaic.version = 11 : i64} {
  func.func @_layernorm_packed_kernel(%arg0: i32, %arg1: memref<4x128xf32, #tpu.memory_space<vmem>>, %arg2: memref<1x128xf32, #tpu.memory_space<vmem>>, %arg3: memref<1x128xf32, #tpu.memory_space<vmem>>, %arg4: memref<128x128xf32, #tpu.memory_space<vmem>>, %arg5: memref<4x128xf32, #tpu.memory_space<vmem>>) attributes {dimension_semantics = [#tpu.dimension_semantics<parallel>], iteration_bounds = array<i64: 1>, scalar_prefetch = 0 : i64, scratch_operands = 0 : i64, tpu.core_type = #tpu.core_type<tc>, window_params = [{transform_indices = @transform_0, window_bounds = array<i64: 4, 128>}, {pipeline_mode = #tpu.pipeline_mode<synchronous>, transform_indices = @transform_1, window_bounds = array<i64: 1, 128>}, {pipeline_mode = #tpu.pipeline_mode<synchronous>, transform_indices = @transform_2, window_bounds = array<i64: 1, 128>}, {pipeline_mode = #tpu.pipeline_mode<synchronous>, transform_indices = @transform_3, window_bounds = array<i64: 128, 128>}, {transform_indices = @transform_4, window_bounds = array<i64: 4, 128>}]} {
    %c0 = arith.constant 0 : index
    %c0_0 = arith.constant 0 : index
    %0 = vector.load %arg1[%c0, %c0_0] : memref<4x128xf32, #tpu.memory_space<vmem>>, vector<4x128xf32>
    %c0_1 = arith.constant 0 : index
    %c0_2 = arith.constant 0 : index
    %1 = vector.load %arg4[%c0_1, %c0_2] : memref<128x128xf32, #tpu.memory_space<vmem>>, vector<128x128xf32>
    %cst = arith.constant dense<0.000000e+00> : vector<4x128xf32>
    %2 = tpu.matmul %0, %1, %cst {dimension_numbers = #tpu.dot_dimension_numbers<[1], [0], [0], [1], [0, 0, 1, 1], [], []>, precision = #tpu.contract_precision<fp32>} : vector<4x128xf32>, vector<128x128xf32>, vector<4x128xf32> -> vector<4x128xf32>
    %3 = arith.mulf %0, %0 : vector<4x128xf32>
    %cst_3 = arith.constant dense<0.000000e+00> : vector<4x128xf32>
    %4 = tpu.matmul %3, %1, %cst_3 {dimension_numbers = #tpu.dot_dimension_numbers<[1], [0], [0], [1], [0, 0, 1, 1], [], []>, precision = #tpu.contract_precision<fp32>} : vector<4x128xf32>, vector<128x128xf32>, vector<4x128xf32> -> vector<4x128xf32>
    %5 = arith.mulf %2, %2 : vector<4x128xf32>
    %6 = arith.subf %4, %5 : vector<4x128xf32>
    %cst_4 = arith.constant 0.000000e+00 : f32
    %7 = vector.broadcast %cst_4 : f32 to vector<4x128xf32>
    %8 = arith.maximumf %6, %7 : vector<4x128xf32>
    %cst_5 = arith.constant 9.99999974E-6 : f32
    %9 = vector.broadcast %cst_5 : f32 to vector<4x128xf32>
    %10 = arith.addf %8, %9 : vector<4x128xf32>
    %11 = math.rsqrt %10 : vector<4x128xf32>
    %12 = arith.subf %0, %2 : vector<4x128xf32>
    %13 = arith.mulf %12, %11 : vector<4x128xf32>
    %c0_6 = arith.constant 0 : index
    %c0_7 = arith.constant 0 : index
    %14 = vector.load %arg2[%c0_6, %c0_7] : memref<1x128xf32, #tpu.memory_space<vmem>>, vector<1x128xf32>
    %15 = vector.broadcast %14 : vector<1x128xf32> to vector<4x128xf32>
    %16 = arith.mulf %13, %15 : vector<4x128xf32>
    %c0_8 = arith.constant 0 : index
    %c0_9 = arith.constant 0 : index
    %17 = vector.load %arg3[%c0_8, %c0_9] : memref<1x128xf32, #tpu.memory_space<vmem>>, vector<1x128xf32>
    %18 = vector.broadcast %17 : vector<1x128xf32> to vector<4x128xf32>
    %19 = arith.addf %16, %18 : vector<4x128xf32>
    %c0_10 = arith.constant 0 : index
    %c0_11 = arith.constant 0 : index
    %20 = vector.load %arg5[%c0_10, %c0_11] : memref<4x128xf32, #tpu.memory_space<vmem>>, vector<4x128xf32>
    tpu.vector_store %arg5[%c0_10, %c0_11], %19 {strides = array<i32>} : memref<4x128xf32, #tpu.memory_space<vmem>>, vector<4x128xf32>,
    return
  }
  func.func @transform_0(%arg0: i32) -> (i32, i32) {
    %c0_i32 = arith.constant 0 : i32
    %c0_i32_0 = arith.constant 0 : i32
    return %arg0, %c0_i32 : i32, i32
  }
  func.func @transform_1(%arg0: i32) -> (i32, i32) {
    %c0_i32 = arith.constant 0 : i32
    %c0_i32_0 = arith.constant 0 : i32
    %c0_i32_1 = arith.constant 0 : i32
    return %c0_i32, %c0_i32_0 : i32, i32
  }
  func.func @transform_2(%arg0: i32) -> (i32, i32) {
    %c0_i32 = arith.constant 0 : i32
    %c0_i32_0 = arith.constant 0 : i32
    %c0_i32_1 = arith.constant 0 : i32
    return %c0_i32, %c0_i32_0 : i32, i32
  }
  func.func @transform_3(%arg0: i32) -> (i32, i32) {
    %c0_i32 = arith.constant 0 : i32
    %c0_i32_0 = arith.constant 0 : i32
    %c0_i32_1 = arith.constant 0 : i32
    return %c0_i32, %c0_i32_0 : i32, i32
  }
  func.func @transform_4(%arg0: i32) -> (i32, i32) {
    %c0_i32 = arith.constant 0 : i32
    %c0_i32_0 = arith.constant 0 : i32
    return %arg0, %c0_i32 : i32, i32
  }
}

</mosaic_0001>

<bundles_post_ra>
// kernel: tpu_custom_call.1
= control target key start
LH: loop header
LB: loop body
LE: loop exit
PB: predicated region body
PF: predicated region fallthrough
CT: control target
= control target key end

     0   :  { %9 = vsyncpa [#allocation3], 0  ;;  %s2769_s0 = inlined_call_operand.hbm [shape: f32[4,128], index: 0, kind: input, shape index: {}]   ;;  %s2770_s1 = inlined_call_operand.vmem [shape: f32[1,128], index: 1, kind: input, shape index: {}]   ;;  %s2771_s2 = inlined_call_operand.vmem [shape: f32[1,128], index: 2, kind: input, shape index: {}]   ;;  %s2772_s3 = inlined_call_operand.hbm [shape: f32[128,128], index: 3, kind: input, shape index: {}]   ;;  %s2773_s4 = inlined_call_operand.hbm [shape: f32[4,128], index: 4, kind: output, shape index: {}]  }
   0x1   :  { %10 = vsyncpa [#allocation6], 0 }
   0x2   :  { %11 = vsyncpa [#allocation4], 0  ;;  %s2085_s15 = smov [#allocation2]   ;;  %s2086_s17 = smov [#allocation5]  }
   0x3   :  { %s18_s16 = sshll.u32 %s2085_s15, 4  ;;  %s31_s18 = sshll.u32 %s2086_s17, 4  ;;  %s19_s16 = int_to_ptr.vmem [resolvable:$true] %s18_s16  ;;  %s32_s18 = int_to_ptr.vmem [resolvable:$true] %s31_s18 }
   0x4   :  { %s2027_s19 = scalar_lea.vmem %s19_s16, 64  ;;  %p2032_p1 = scmp.lt.s32.totalorder %s19_s16, %s19_s16 }
   0x5   :  { %p2028_p0 = scmp.ne.s32.totalorder %s19_s16, %s2027_s19  ;;  %p2033_p2 = scmp.lt.s32.totalorder %s2027_s19, %s2027_s19 }
   0x7   :  { %p2034_p3 = por %p2033_p2, %p2032_p1 }
   0x9   :  { %p2035_p4 = pnand %p2034_p3, %p2028_p0 }
   0xb   :  { %2038 = shalt.err (!%p2035_p4)
}
   0xc   :  { %21 = dma.hbm_to_vmem [thread:$0]  %s2769_s0, 64, %s19_s16, [#allocation3]  }
   0xd   :  { %s2047_s22 = scalar_lea.vmem %s32_s18, 2048  ;;  %p2052_p6 = scmp.lt.s32.totalorder %s32_s18, %s32_s18 }
   0xe   :  { %p2048_p5 = scmp.ne.s32.totalorder %s32_s18, %s2047_s22  ;;  %p2053_p7 = scmp.lt.s32.totalorder %s2047_s22, %s2047_s22 }
  0x10   :  { %p2054_p8 = por %p2053_p7, %p2052_p6 }
  0x12   :  { %p2055_p9 = pnand %p2054_p8, %p2048_p5 }
  0x14   :  { %2058 = shalt.err (!%p2055_p9)
}
  0x15   :  { %s2087_s23 = smov 128   ;;  %s2088_s24 = smov 8  }
  0x16   :  { %37 = dma.hbm_to_vmem [thread:$0]  %s2772_s3, 2048, %s32_s18, [#allocation6], %s2087_s23, %s2087_s23, %s2088_s24  }
  0x17   :  { %2079 = dma.done.wait [#allocation3], 64  }
  0x18   :  { %2080 = vsyncadd [#allocation3], 4294967232 }
  0x19   :  { %2081 = dma.done.wait [#allocation6], 2048  }
  0x1a   :  { %2082 = vsyncadd [#allocation6], 4294965248  ;;  %v2089_v0 = vmov 0.0   ;;  %vm2090_vm0 = vmmov 0   ;;  %v60_v1 = vld [vmem:[#allocation5 + $0x78] sm:$0xff]  ;;  %v59_v2 = vld [vmem:[#allocation5 + $0x70] sm:$0xff] }
  0x1b   :  { %1590 = vmatprep.subr.mxu0 %v2089_v0  ;;  %1625 = vmatprep.subr.mxu1 %v2089_v0  ;;  %v58_v3 = vld [vmem:[#allocation5 + $0x68] sm:$0xff]  ;;  %v2129_v4 = vand.u32 4294901760, %v60_v1  ;;  %v2131_v5 = vand.u32 4294901760, %v59_v2  ;;  %v57_v7 = vld [vmem:[#allocation5 + $0x60] sm:$0xff]  ;;  %v56_v8 = vld [vmem:[#allocation5 + $0x58] sm:$0xff]  ;;  %s2091_s29 = smov [#allocation7]  }
  0x1c   :  { %1622 = vmatprep.mubr.msk.f32.mxu0 %vm2090_vm0, %v2089_v0  ;;  %1657 = vmatprep.mubr.msk.f32.mxu1 %vm2090_vm0, %v2089_v0  ;;  %v2133_v6 = vand.u32 4294901760, %v58_v3  ;;  %v55_v9 = vld [vmem:[#allocation5 + $0x50] sm:$0xff]  ;;  %v2135_v10 = vand.u32 4294901760, %v57_v7  ;;  %v2137_v11 = vand.u32 4294901760, %v56_v8  ;;  %v54_v13 = vld [vmem:[#allocation5 + $0x48] sm:$0xff]  ;;  %v53_v14 = vld [vmem:[#allocation5 + $0x40] sm:$0xff] }
  0x1d   :  { %v2139_v12 = vand.u32 4294901760, %v55_v9  ;;  %1591 = vmatpush3.msra.mxu0 %v2129_v4  ;;  %v2143_v15 = vsub.f32 %v60_v1, %v2129_v4  ;;  %v2146_v16 = vsub.f32 %v59_v2, %v2131_v5  ;;  %v2148_v17 = vand.u32 4294901760, %v54_v13  ;;  %v52_v19 = vld [vmem:[#allocation5 + $0x38] sm:$0xff]  ;;  %v51_v26 = vld [vmem:[#allocation5 + $0x30] sm:$0xff]  ;;  %v50_v36 = vld [vmem:[#allocation5 + $0x28] sm:$0xff]  ;;  %s1374_s30 = sshll.u32 %s2091_s29, 4  ;;  %s1375_s30 = int_to_ptr.vmem [resolvable:$true] %s1374_s30 }
  0x1e   :  { %v2151_v18 = vsub.f32 %v58_v3, %v2133_v6  ;;  %1592 = vmatprep.subr.mxu0 %v2089_v0  ;;  %v2155_v20 = vsub.f32 %v57_v7, %v2135_v10  ;;  %v2158_v21 = vsub.f32 %v56_v8, %v2137_v11  ;;  %v2170_v25 = vand.u32 4294901760, %v53_v14  ;;  %v49_v41 = vld [vmem:[#allocation5 + $0x20] sm:$0xff]  ;;  %v48_v49 = vld [vmem:[#allocation5 + $0x18] sm:$0xff]  ;;  %v47_v54 = vld [vmem:[#allocation5 + $0x10] sm:$0xff]  ;;  %s2059_s5 = scalar_lea.vmem %s1375_s30, 64  ;;  %p2064_p11 = scmp.lt.s32.totalorder %s1375_s30, %s1375_s30 }
  0x1f   :  { %1593 = vmatpush3.msra.mxu0 %v2131_v5  ;;  %v2162_v22 = vand.u32 4294901760, %v2143_v15  ;;  %v2165_v23 = vand.u32 4294901760, %v2146_v16  ;;  %v2176_v28 = vand.u32 4294901760, %v52_v19  ;;  %v2182_v30 = vsub.f32 %v55_v9, %v2139_v12  ;;  %v2229_v50 = vld [vmem:[#allocation2] sm:$0xf]  ;;  %v46_v60 = vld [vmem:[#allocation5 + $0x8] sm:$0xff]  ;;  %p2060_p10 = scmp.ne.s32.totalorder %s1375_s30, %s2059_s5  ;;  %p2065_p12 = scmp.lt.s32.totalorder %s2059_s5, %s2059_s5 }
  0x20   :  { %v2168_v24 = vand.u32 4294901760, %v2151_v18  ;;  %1594 = vmatprep.subr.mxu0 %v2089_v0  ;;  %v2174_v27 = vand.u32 4294901760, %v2155_v20  ;;  %v2179_v29 = vand.u32 4294901760, %v2158_v21  ;;  %v2192_v34 = vsub.f32 %v54_v13, %v2148_v17  ;;  %v45_v7 = vld [vmem:[#allocation5] sm:$0xff] }
  0x21   :  { %1595 = vmatpush3.msra.mxu0 %v2133_v6  ;;  %v156_v31 = vsub.f32 %v2143_v15, %v2162_v22  ;;  %v163_v32 = vsub.f32 %v2146_v16, %v2165_v23  ;;  %v2195_v35 = vand.u32 4294901760, %v51_v26  ;;  %v2205_v40 = vand.u32 4294901760, %v2182_v30  ;;  %p2066_p13 = por %p2065_p12, %p2064_p11 }
  0x22   :  { %v170_v33 = vsub.f32 %v2151_v18, %v2168_v24  ;;  %1596 = vmatprep.subr.mxu0 %v2089_v0  ;;  %v177_v39 = vsub.f32 %v2155_v20, %v2174_v27  ;;  %v184_v42 = vsub.f32 %v2158_v21, %v2179_v29  ;;  %v2211_v43 = vsub.f32 %v53_v14, %v2170_v25 }
  0x23   :  { %1597 = vmatpush3.msra.mxu0 %v2135_v10  ;;  %v2198_v37 = vand.u32 4294901760, %v156_v31  ;;  %v2200_v38 = vand.u32 4294901760, %v163_v32  ;;  %v2217_v45 = vand.u32 4294901760, %v50_v36  ;;  %v2220_v46 = vand.u32 4294901760, %v2192_v34  ;;  %p2067_p0 = pnand %p2066_p13, %p2060_p10 }
  0x24   :  { %1598 = vmatprep.subr.mxu0 %v2089_v0  ;;  %v2215_v44 = vand.u32 4294901760, %v170_v33  ;;  %v2223_v47 = vsub.f32 %v52_v19, %v2176_v28  ;;  %v2227_v48 = vand.u32 4294901760, %v49_v41  ;;  %v2233_v51 = vand.u32 4294901760, %v177_v39 }
  0x25   :  { %1599 = vmatpush3.msra.mxu0 %v2137_v11  ;;  %1626 = vmatpush3.msra.mxu1 %v2198_v37  ;;  %v191_v52 = vsub.f32 %v2182_v30, %v2205_v40  ;;  %v2238_v53 = vand.u32 4294901760, %v2211_v43  ;;  %v2241_v55 = vsub.f32 %v51_v26, %v2195_v35  ;;  %v2245_v56 = vand.u32 4294901760, %v184_v42 }
  0x26   :  { %2782 = vst [vmem:[#allocation11_spill] sm:$0xff] %v2215_v44  ;;  %1600 = vmatprep.subr.mxu0 %v2089_v0  ;;  %1627 = vmatprep.subr.mxu1 %v2089_v0  ;;  %2783 = vst [vmem:[#allocation12_spill] sm:$0xff] %v2233_v51  ;;  %v2248_v57 = vand.u32 4294901760, %v2223_v47  ;;  %v198_v58 = vsub.f32 %v2192_v34, %v2220_v46  ;;  %v2254_v59 = vand.u32 4294901760, %v48_v49  ;;  %v2260_v62 = vand.u32 4294901760, %v2229_v50 }
  0x27   :  { %1601 = vmatpush3.msra.mxu0 %v2139_v12  ;;  %1628 = vmatpush3.msra.mxu1 %v2200_v38  ;;  %2784 = vst [vmem:[#allocation13_spill] sm:$0xff] %v2245_v56  ;;  %v2257_v61 = vsub.f32 %v50_v36, %v2217_v45  ;;  %v2264_v63 = vand.u32 4294901760, %v47_v54  ;;  %v2268_v1 = vand.u32 4294901760, %v191_v52  ;;  %v205_v2 = vsub.f32 %v2211_v43, %v2238_v53 }
  0x28   :  { %1602 = vmatprep.subr.mxu0 %v2089_v0  ;;  %1629 = vmatprep.subr.mxu1 %v2089_v0  ;;  %v2273_v3 = vand.u32 4294901760, %v2241_v55  ;;  %v2276_v8 = vsub.f32 %v49_v41, %v2227_v48  ;;  %v212_v9 = vsub.f32 %v2223_v47, %v2248_v57  ;;  %v2282_v13 = vand.u32 4294901760, %v46_v60 }
  0x29   :  { %1603 = vmatpush3.msra.mxu0 %v2148_v17  ;;  %1630 = vmatpush3.msra.mxu1 %v2215_v44  ;;  %2785 = vst [vmem:[#allocation14_spill] sm:$0xff] %v2268_v1  ;;  %v2286_v14 = vand.u32 4294901760, %v198_v58  ;;  %v2289_v19 = vand.u32 4294901760, %v2257_v61  ;;  %v2293_v26 = vsub.f32 %v2229_v50, %v2260_v62  ;;  %v2296_v31 = vsub.f32 %v48_v49, %v2254_v59 }
  0x2a   :  { %1604 = vmatprep.subr.mxu0 %v2089_v0  ;;  %1631 = vmatprep.subr.mxu1 %v2089_v0  ;;  %v2300_v32 = vand.u32 4294901760, %v45_v7  ;;  %v2304_v33 = vand.u32 4294901760, %v205_v2  ;;  %v219_v36 = vsub.f32 %v2241_v55, %v2273_v3  ;;  %v2309_v39 = vand.u32 4294901760, %v2276_v8 }
  0x2b   :  { %1605 = vmatpush3.msra.mxu0 %v2170_v25  ;;  %1632 = vmatpush3.msra.mxu1 %v2233_v51  ;;  %2786 = vst [vmem:[#allocation15_spill] sm:$0xff] %v2286_v14  ;;  %v2312_v41 = vsub.f32 %v47_v54, %v2264_v63  ;;  %v2316_v42 = vand.u32 4294901760, %v212_v9  ;;  %v226_v49 = vsub.f32 %v2257_v61, %v2289_v19  ;;  %v2324_v58 = vand.u32 4294901760, %v2296_v31 }
  0x2c   :  { %1606 = vmatprep.subr.mxu0 %v2089_v0  ;;  %1633 = vmatprep.subr.mxu1 %v2089_v0  ;;  %2787 = vst [vmem:[#allocation16_spill] sm:$0xff] %v2304_v33  ;;  %v2327_v54 = vsub.f32 %v46_v60, %v2282_v13  ;;  %v2333_v2 = vand.u32 4294901760, %v219_v36  ;;  %v233_v9 = vsub.f32 %v2276_v8, %v2309_v39  ;;  %v2790_v36 = vand.u32 4294901760, %v2293_v26 }
  0x2d   :  { %1607 = vmatpush3.msra.mxu0 %v2176_v28  ;;  %1634 = vmatpush3.msra.mxu1 %v2245_v56  ;;  %2788 = vst [vmem:[#allocation17_spill] sm:$0xff] %v2316_v42  ;;  %v2338_v52 = vand.u32 4294901760, %v2312_v41  ;;  %v2347_v60 = vand.u32 4294901760, %v226_v49 }
  0x2e   :  { %1608 = vmatprep.subr.mxu0 %v2089_v0  ;;  %1635 = vmatprep.subr.mxu1 %v2089_v0  ;;  %2789 = vst [vmem:[#allocation18_spill] sm:$0xff] %v2333_v2  ;;  %v2361_v49 = vand.u32 4294901760, %v233_v9 }
  0x2f   :  { %1609 = vmatpush3.msra.mxu0 %v2195_v35  ;;  %1636 = vmatpush3.msra.mxu1 %v2268_v1  ;;  %v240_v1 = vsub.f32 %v2296_v31, %v2324_v58 }
  0x30   :  { %1610 = vmatprep.subr.mxu0 %v2089_v0  ;;  %1637 = vmatprep.subr.mxu1 %v2089_v0 }
  0x31   :  { %1611 = vmatpush3.msra.mxu0 %v2217_v45  ;;  %1638 = vmatpush3.msra.mxu1 %v2286_v14  ;;  %v2341_v14 = vsub.f32 %v45_v7, %v2300_v32  ;;  %v2355_v7 = vand.u32 4294901760, %v2327_v54  ;;  %v2372_v51 = vand.u32 4294901760, %v240_v1 }
  0x32   :  { %1612 = vmatprep.subr.mxu0 %v2089_v0  ;;  %1639 = vmatprep.subr.mxu1 %v2089_v0 }
  0x33   :  { %1613 = vmatpush3.msra.mxu0 %v2227_v48  ;;  %1640 = vmatpush3.msra.mxu1 %v2304_v33  ;;  %v145_v33 = vsub.f32 %v2293_v26, %v2790_v36  ;;  %v2366_v36 = vand.u32 4294901760, %v2341_v14  ;;  %v254_v9 = vsub.f32 %v2327_v54, %v2355_v7 }
  0x34   :  { %1614 = vmatprep.subr.mxu0 %v2089_v0  ;;  %1641 = vmatprep.subr.mxu1 %v2089_v0 }
  0x35   :  { %1615 = vmatpush3.msra.mxu0 %v2254_v59  ;;  %1642 = vmatpush3.msra.mxu1 %v2316_v42  ;;  %v247_v42 = vsub.f32 %v2312_v41, %v2338_v52  ;;  %v146_v56 = vand.u32 4294901760, %v145_v33  ;;  %v261_v44 = vsub.f32 %v2341_v14, %v2366_v36  ;;  %v2387_v1 = vand.u32 4294901760, %v254_v9  ;;  %v2795_v9 = vld [vmem:[#allocation14_spill] sm:$0xff] }
  0x36   :  { %1616 = vmatprep.subr.mxu0 %v2089_v0  ;;  %1643 = vmatprep.subr.mxu1 %v2089_v0 }
  0x37   :  { %1617 = vmatpush3.msra.mxu0 %v2264_v63  ;;  %1644 = vmatpush3.msra.mxu1 %v2333_v2  ;;  %v2380_v2 = vand.u32 4294901760, %v247_v42  ;;  %v2393_v33 = vand.u32 4294901760, %v261_v44  ;;  %v2791_v44 = vand.u32 4294901760, %v2293_v26 }
  0x38   :  { %1618 = vmatprep.subr.mxu0 %v2089_v0  ;;  %1645 = vmatprep.subr.mxu1 %v2089_v0 }
  0x39   :  { %1619 = vmatpush3.msra.mxu0 %v2282_v13  ;;  %1646 = vmatpush3.msra.mxu1 %v2347_v60 }
  0x3a   :  { %1620 = vmatprep.subr.mxu0 %v2089_v0  ;;  %1647 = vmatprep.subr.mxu1 %v2089_v0 }
  0x3b   :  { %1621 = vmatpush3.msra.mxu0 %v2300_v32  ;;  %1648 = vmatpush3.msra.mxu1 %v2361_v49 }
  0x3c   :  { %1649 = vmatprep.subr.mxu1 %v2089_v0  ;;  %1660 = vmatprep.subr.mxu0 %v2089_v0 }
  0x3d   :  { %1623 = vmatmul.mubr.f32.vlgmr.msra.gmra.mxu0 %v146_v56  ;;  %1650 = vmatpush3.msra.mxu1 %v2372_v51  ;;  %v702_v56 = vmul.f32 %v2229_v50, %v2229_v50 }
  0x3e   :  { %1661 = vmatpush3.msra.mxu0 %v2143_v15  ;;  %1651 = vmatprep.subr.mxu1 %v2089_v0 }
  0x3f   :  { %1662 = vmatprep.subr.mxu0 %v2089_v0  ;;  %1652 = vmatpush3.msra.mxu1 %v2380_v2 }
  0x40   :  { %1663 = vmatpush3.msra.mxu0 %v2146_v16  ;;  %1653 = vmatprep.subr.mxu1 %v2089_v0 }
  0x41   :  { %1664 = vmatprep.subr.mxu0 %v2089_v0  ;;  %1654 = vmatpush3.msra.mxu1 %v2387_v1 }
  0x42   :  { %1665 = vmatpush3.msra.mxu0 %v2151_v18  ;;  %1655 = vmatprep.subr.mxu1 %v2089_v0 }
  0x43   :  { %1666 = vmatprep.subr.mxu0 %v2089_v0  ;;  %1656 = vmatpush3.msra.mxu1 %v2393_v33 }
  0x44   :  { %1667 = vmatpush3.msra.mxu0 %v2155_v20  ;;  %1658 = vmatmul.mubr.f32.vlgmr.msra.gmra.mxu1 %v2260_v62 }
  0x45   :  { %1668 = vmatprep.subr.mxu0 %v2089_v0  ;;  %1695 = vmatprep.subr.mxu1 %v2089_v0 }
  0x46   :  { %1669 = vmatpush3.msra.mxu0 %v2158_v21  ;;  %1696 = vmatpush3.msra.mxu1 %v2129_v4 }
  0x47   :  { %1670 = vmatprep.subr.mxu0 %v2089_v0  ;;  %1697 = vmatprep.subr.mxu1 %v2089_v0 }
  0x48   :  { %1671 = vmatpush3.msra.mxu0 %v2182_v30  ;;  %1698 = vmatpush3.msra.mxu1 %v2131_v5 }
  0x49   :  { %1672 = vmatprep.subr.mxu0 %v2089_v0  ;;  %1699 = vmatprep.subr.mxu1 %v2089_v0 }
  0x4a   :  { %1673 = vmatpush3.msra.mxu0 %v2192_v34  ;;  %1700 = vmatpush3.msra.mxu1 %v2133_v6 }
  0x4b   :  { %1674 = vmatprep.subr.mxu0 %v2089_v0  ;;  %1701 = vmatprep.subr.mxu1 %v2089_v0 }
  0x4c   :  { %1675 = vmatpush3.msra.mxu0 %v2211_v43  ;;  %1702 = vmatpush3.msra.mxu1 %v2135_v10 }
  0x4d   :  { %1676 = vmatprep.subr.mxu0 %v2089_v0  ;;  %1703 = vmatprep.subr.mxu1 %v2089_v0 }
  0x4e   :  { %1677 = vmatpush3.msra.mxu0 %v2223_v47  ;;  %1704 = vmatpush3.msra.mxu1 %v2137_v11 }
  0x4f   :  { %1678 = vmatprep.subr.mxu0 %v2089_v0  ;;  %1705 = vmatprep.subr.mxu1 %v2089_v0 }
  0x50   :  { %1679 = vmatpush3.msra.mxu0 %v2241_v55  ;;  %1706 = vmatpush3.msra.mxu1 %v2139_v12 }
  0x51   :  { %1680 = vmatprep.subr.mxu0 %v2089_v0  ;;  %1707 = vmatprep.subr.mxu1 %v2089_v0 }
  0x52   :  { %1681 = vmatpush3.msra.mxu0 %v2257_v61  ;;  %1708 = vmatpush3.msra.mxu1 %v2148_v17 }
  0x53   :  { %1682 = vmatprep.subr.mxu0 %v2089_v0  ;;  %1709 = vmatprep.subr.mxu1 %v2089_v0 }
  0x54   :  { %1683 = vmatpush3.msra.mxu0 %v2276_v8  ;;  %1710 = vmatpush3.msra.mxu1 %v2170_v25 }
  0x55   :  { %1684 = vmatprep.subr.mxu0 %v2089_v0  ;;  %1711 = vmatprep.subr.mxu1 %v2089_v0 }
  0x56   :  { %1685 = vmatpush3.msra.mxu0 %v2296_v31  ;;  %1712 = vmatpush3.msra.mxu1 %v2176_v28 }
  0x57   :  { %1686 = vmatprep.subr.mxu0 %v2089_v0  ;;  %1713 = vmatprep.subr.mxu1 %v2089_v0 }
  0x58   :  { %1687 = vmatpush3.msra.mxu0 %v2312_v41  ;;  %1714 = vmatpush3.msra.mxu1 %v2195_v35 }
  0x59   :  { %1688 = vmatprep.subr.mxu0 %v2089_v0  ;;  %1715 = vmatprep.subr.mxu1 %v2089_v0 }
  0x5a   :  { %1689 = vmatpush3.msra.mxu0 %v2327_v54  ;;  %1716 = vmatpush3.msra.mxu1 %v2217_v45 }
  0x5b   :  { %1690 = vmatprep.subr.mxu0 %v2089_v0  ;;  %1717 = vmatprep.subr.mxu1 %v2089_v0 }
  0x5c   :  { %1691 = vmatpush3.msra.mxu0 %v2341_v14  ;;  %1692 = vmatprep.mubr.msk.f32.mxu0 %vm2090_vm0, %v2089_v0 }
  0x5d   :  { %1718 = vmatpush3.msra.mxu1 %v2227_v48  ;;  %1693 = vmatmul.mubr.f32.vlgmr.msra.gmra.mxu0 %v2293_v26  ;;  %v2793_v26 = vld [vmem:[#allocation12_spill] sm:$0xff] }
  0x5e   :  { %1719 = vmatprep.subr.mxu1 %v2089_v0  ;;  %1730 = vmatprep.subr.mxu0 %v2089_v0 }
  0x5f   :  { %1720 = vmatpush3.msra.mxu1 %v2254_v59  ;;  %1731 = vmatpush3.msra.mxu0 %v2162_v22 }
  0x60   :  { %1721 = vmatprep.subr.mxu1 %v2089_v0  ;;  %1732 = vmatprep.subr.mxu0 %v2089_v0 }
  0x61   :  { %1722 = vmatpush3.msra.mxu1 %v2264_v63  ;;  %1733 = vmatpush3.msra.mxu0 %v2165_v23 }
  0x62   :  { %1723 = vmatprep.subr.mxu1 %v2089_v0  ;;  %1734 = vmatprep.subr.mxu0 %v2089_v0 }
  0x63   :  { %1724 = vmatpush3.msra.mxu1 %v2282_v13  ;;  %1735 = vmatpush3.msra.mxu0 %v2168_v24 }
  0x64   :  { %1725 = vmatprep.subr.mxu1 %v2089_v0  ;;  %1736 = vmatprep.subr.mxu0 %v2089_v0 }
  0x65   :  { %1726 = vmatpush3.msra.mxu1 %v2300_v32  ;;  %1727 = vmatprep.mubr.msk.f32.mxu1 %vm2090_vm0, %v2089_v0 }
  0x66   :  { %1737 = vmatpush3.msra.mxu0 %v2174_v27  ;;  %1728 = vmatmul.mubr.f32.vlgmr.msra.gmra.mxu1 %v2791_v44  ;;  %v2796_v44 = vld [vmem:[#allocation15_spill] sm:$0xff] }
  0x67   :  { %1738 = vmatprep.subr.mxu0 %v2089_v0  ;;  %1765 = vmatprep.subr.mxu1 %v2089_v0 }
  0x68   :  { %1739 = vmatpush3.msra.mxu0 %v2179_v29  ;;  %1766 = vmatpush3.msra.mxu1 %v2129_v4 }
  0x69   :  { %1740 = vmatprep.subr.mxu0 %v2089_v0  ;;  %1767 = vmatprep.subr.mxu1 %v2089_v0 }
  0x6a   :  { %1741 = vmatpush3.msra.mxu0 %v2205_v40  ;;  %1768 = vmatpush3.msra.mxu1 %v2131_v5 }
  0x6b   :  { %1742 = vmatprep.subr.mxu0 %v2089_v0  ;;  %1769 = vmatprep.subr.mxu1 %v2089_v0 }
  0x6c   :  { %1743 = vmatpush3.msra.mxu0 %v2220_v46  ;;  %1770 = vmatpush3.msra.mxu1 %v2133_v6 }
  0x6d   :  { %1744 = vmatprep.subr.mxu0 %v2089_v0  ;;  %1771 = vmatprep.subr.mxu1 %v2089_v0 }
  0x6e   :  { %1745 = vmatpush3.msra.mxu0 %v2238_v53  ;;  %1772 = vmatpush3.msra.mxu1 %v2135_v10 }
  0x6f   :  { %1746 = vmatprep.subr.mxu0 %v2089_v0  ;;  %1773 = vmatprep.subr.mxu1 %v2089_v0 }
  0x70   :  { %1747 = vmatpush3.msra.mxu0 %v2248_v57  ;;  %1774 = vmatpush3.msra.mxu1 %v2137_v11 }
  0x71   :  { %1748 = vmatprep.subr.mxu0 %v2089_v0  ;;  %1775 = vmatprep.subr.mxu1 %v2089_v0 }
  0x72   :  { %1749 = vmatpush3.msra.mxu0 %v2273_v3  ;;  %1776 = vmatpush3.msra.mxu1 %v2139_v12 }
  0x73   :  { %1750 = vmatprep.subr.mxu0 %v2089_v0  ;;  %1777 = vmatprep.subr.mxu1 %v2089_v0 }
  0x74   :  { %1751 = vmatpush3.msra.mxu0 %v2289_v19  ;;  %1778 = vmatpush3.msra.mxu1 %v2148_v17 }
  0x75   :  { %1752 = vmatprep.subr.mxu0 %v2089_v0  ;;  %1779 = vmatprep.subr.mxu1 %v2089_v0 }
  0x76   :  { %1753 = vmatpush3.msra.mxu0 %v2309_v39  ;;  %1780 = vmatpush3.msra.mxu1 %v2170_v25 }
  0x77   :  { %1754 = vmatprep.subr.mxu0 %v2089_v0  ;;  %1781 = vmatprep.subr.mxu1 %v2089_v0 }
  0x78   :  { %1755 = vmatpush3.msra.mxu0 %v2324_v58  ;;  %1782 = vmatpush3.msra.mxu1 %v2176_v28 }
  0x79   :  { %1756 = vmatprep.subr.mxu0 %v2089_v0  ;;  %1783 = vmatprep.subr.mxu1 %v2089_v0 }
  0x7a   :  { %1757 = vmatpush3.msra.mxu0 %v2338_v52  ;;  %1784 = vmatpush3.msra.mxu1 %v2195_v35 }
  0x7b   :  { %1758 = vmatprep.subr.mxu0 %v2089_v0  ;;  %1785 = vmatprep.subr.mxu1 %v2089_v0 }
  0x7c   :  { %1759 = vmatpush3.msra.mxu0 %v2355_v7  ;;  %1786 = vmatpush3.msra.mxu1 %v2217_v45 }
  0x7d   :  { %1760 = vmatprep.subr.mxu0 %v2089_v0  ;;  %1787 = vmatprep.subr.mxu1 %v2089_v0 }
  0x7e   :  { %1761 = vmatpush3.msra.mxu0 %v2366_v36  ;;  %1762 = vmatprep.mubr.msk.f32.mxu0 %vm2090_vm0, %v2089_v0 }
  0x7f   :  { %1788 = vmatpush3.msra.mxu1 %v2227_v48  ;;  %1763 = vmatmul.mubr.f32.vlgmr.msra.gmra.mxu0 %v2260_v62 }
  0x80   :  { %1789 = vmatprep.subr.mxu1 %v2089_v0  ;;  %1800 = vmatprep.subr.mxu0 %v2089_v0 }
  0x81   :  { %1790 = vmatpush3.msra.mxu1 %v2254_v59  ;;  %1801 = vmatpush3.msra.mxu0 %v2129_v4 }
  0x82   :  { %1791 = vmatprep.subr.mxu1 %v2089_v0  ;;  %1802 = vmatprep.subr.mxu0 %v2089_v0 }
  0x83   :  { %1792 = vmatpush3.msra.mxu1 %v2264_v63  ;;  %1803 = vmatpush3.msra.mxu0 %v2131_v5 }
  0x84   :  { %1793 = vmatprep.subr.mxu1 %v2089_v0  ;;  %1804 = vmatprep.subr.mxu0 %v2089_v0 }
  0x85   :  { %1794 = vmatpush3.msra.mxu1 %v2282_v13  ;;  %1805 = vmatpush3.msra.mxu0 %v2133_v6 }
  0x86   :  { %1795 = vmatprep.subr.mxu1 %v2089_v0  ;;  %1806 = vmatprep.subr.mxu0 %v2089_v0 }
  0x87   :  { %1796 = vmatpush3.msra.mxu1 %v2300_v32  ;;  %1797 = vmatprep.mubr.msk.f32.mxu1 %vm2090_vm0, %v2089_v0 }
  0x88   :  { %1807 = vmatpush3.msra.mxu0 %v2135_v10  ;;  %1798 = vmatmul.mubr.f32.vlgmr.msra.gmra.mxu1 %v2260_v62  ;;  %v2792_v62 = vld [vmem:[#allocation11_spill] sm:$0xff] }
  0x89   :  { %1808 = vmatprep.subr.mxu0 %v2089_v0  ;;  %1835 = vmatprep.subr.mxu1 %v2089_v0 }
  0x8a   :  { %1809 = vmatpush3.msra.mxu0 %v2137_v11  ;;  %1836 = vmatpush3.msra.mxu1 %v2198_v37  ;;  %v2560_v37 = vand.u32 4294901760, %v702_v56 }
  0x8b   :  { %1810 = vmatprep.subr.mxu0 %v2089_v0  ;;  %1837 = vmatprep.subr.mxu1 %v2089_v0 }
  0x8c   :  { %1811 = vmatpush3.msra.mxu0 %v2139_v12  ;;  %1838 = vmatpush3.msra.mxu1 %v2200_v38  ;;  %v2794_v38 = vld [vmem:[#allocation13_spill] sm:$0xff]  ;;  %v2571_v42 = vsub.f32 %v702_v56, %v2560_v37  ;;  %v2797_v56 = vld [vmem:[#allocation16_spill] sm:$0xff] }
  0x8d   :  { %1812 = vmatprep.subr.mxu0 %v2089_v0  ;;  %1839 = vmatprep.subr.mxu1 %v2089_v0 }
  0x8e   :  { %1813 = vmatpush3.msra.mxu0 %v2148_v17  ;;  %1840 = vmatpush3.msra.mxu1 %v2792_v62  ;;  %v786_v62 = vand.u32 4294901760, %v2571_v42 }
  0x8f   :  { %1814 = vmatprep.subr.mxu0 %v2089_v0  ;;  %1841 = vmatprep.subr.mxu1 %v2089_v0 }
  0x90   :  { %1815 = vmatpush3.msra.mxu0 %v2170_v25  ;;  %1842 = vmatpush3.msra.mxu1 %v2793_v26  ;;  %v2798_v26 = vld [vmem:[#allocation17_spill] sm:$0xff] }
  0x91   :  { %1816 = vmatprep.subr.mxu0 %v2089_v0  ;;  %1843 = vmatprep.subr.mxu1 %v2089_v0 }
  0x92   :  { %1817 = vmatpush3.msra.mxu0 %v2176_v28  ;;  %1844 = vmatpush3.msra.mxu1 %v2794_v38  ;;  %v787_v38 = vsub.f32 %v2571_v42, %v786_v62 }
  0x93   :  { %1818 = vmatprep.subr.mxu0 %v2089_v0  ;;  %1845 = vmatprep.subr.mxu1 %v2089_v0 }
  0x94   :  { %1819 = vmatpush3.msra.mxu0 %v2195_v35  ;;  %1846 = vmatpush3.msra.mxu1 %v2795_v9  ;;  %v2799_v9 = vld [vmem:[#allocation18_spill] sm:$0xff] }
  0x95   :  { %1820 = vmatprep.subr.mxu0 %v2089_v0  ;;  %1847 = vmatprep.subr.mxu1 %v2089_v0 }
  0x96   :  { %1821 = vmatpush3.msra.mxu0 %v2217_v45  ;;  %1848 = vmatpush3.msra.mxu1 %v2796_v44  ;;  %v788_v44 = vand.u32 4294901760, %v787_v38 }
  0x97   :  { %1822 = vmatprep.subr.mxu0 %v2089_v0  ;;  %1849 = vmatprep.subr.mxu1 %v2089_v0 }
  0x98   :  { %1823 = vmatpush3.msra.mxu0 %v2227_v48  ;;  %1850 = vmatpush3.msra.mxu1 %v2797_v56 }
  0x99   :  { %1824 = vmatprep.subr.mxu0 %v2089_v0  ;;  %1851 = vmatprep.subr.mxu1 %v2089_v0 }
  0x9a   :  { %1825 = vmatpush3.msra.mxu0 %v2254_v59  ;;  %1852 = vmatpush3.msra.mxu1 %v2798_v26 }
  0x9b   :  { %1826 = vmatprep.subr.mxu0 %v2089_v0  ;;  %1853 = vmatprep.subr.mxu1 %v2089_v0 }
  0x9c   :  { %1827 = vmatpush3.msra.mxu0 %v2264_v63  ;;  %1854 = vmatpush3.msra.mxu1 %v2799_v9 }
  0x9d   :  { %1828 = vmatprep.subr.mxu0 %v2089_v0  ;;  %1855 = vmatprep.subr.mxu1 %v2089_v0 }
  0x9e   :  { %1829 = vmatpush3.msra.mxu0 %v2282_v13  ;;  %1856 = vmatpush3.msra.mxu1 %v2347_v60 }
  0x9f   :  { %1830 = vmatprep.subr.mxu0 %v2089_v0  ;;  %1857 = vmatprep.subr.mxu1 %v2089_v0 }
  0xa0   :  { %1831 = vmatpush3.msra.mxu0 %v2300_v32  ;;  %1858 = vmatpush3.msra.mxu1 %v2361_v49 }
  0xa1   :  { %1832 = vmatprep.mubr.msk.f32.mxu0 %vm2090_vm0, %v2089_v0  ;;  %1859 = vmatprep.subr.mxu1 %v2089_v0 }
  0xa2   :  { %1870 = vmatprep.subr.mxu0 %v2089_v0  ;;  %1833 = vmatmul.mubr.f32.vlgmr.msra.gmra.mxu0 %v788_v44 }
  0xa3   :  { %1860 = vmatpush3.msra.mxu1 %v2372_v51  ;;  %1871 = vmatpush3.msra.mxu0 %v2143_v15 }
  0xa4   :  { %1861 = vmatprep.subr.mxu1 %v2089_v0  ;;  %1872 = vmatprep.subr.mxu0 %v2089_v0 }
  0xa5   :  { %1862 = vmatpush3.msra.mxu1 %v2380_v2  ;;  %1873 = vmatpush3.msra.mxu0 %v2146_v16 }
  0xa6   :  { %1863 = vmatprep.subr.mxu1 %v2089_v0  ;;  %1874 = vmatprep.subr.mxu0 %v2089_v0 }
  0xa7   :  { %1864 = vmatpush3.msra.mxu1 %v2387_v1  ;;  %1875 = vmatpush3.msra.mxu0 %v2151_v18 }
  0xa8   :  { %1865 = vmatprep.subr.mxu1 %v2089_v0  ;;  %1876 = vmatprep.subr.mxu0 %v2089_v0 }
  0xa9   :  { %1866 = vmatpush3.msra.mxu1 %v2393_v33  ;;  %1867 = vmatprep.mubr.msk.f32.mxu1 %vm2090_vm0, %v2089_v0 }
  0xaa   :  { %1877 = vmatpush3.msra.mxu0 %v2155_v20  ;;  %1868 = vmatmul.mubr.f32.vlgmr.msra.gmra.mxu1 %v2560_v37 }
  0xab   :  { %1878 = vmatprep.subr.mxu0 %v2089_v0  ;;  %1905 = vmatprep.subr.mxu1 %v2089_v0 }
  0xac   :  { %1879 = vmatpush3.msra.mxu0 %v2158_v21  ;;  %1906 = vmatpush3.msra.mxu1 %v2129_v4 }
  0xad   :  { %1880 = vmatprep.subr.mxu0 %v2089_v0  ;;  %1907 = vmatprep.subr.mxu1 %v2089_v0 }
  0xae   :  { %1881 = vmatpush3.msra.mxu0 %v2182_v30  ;;  %1908 = vmatpush3.msra.mxu1 %v2131_v5 }
  0xaf   :  { %1882 = vmatprep.subr.mxu0 %v2089_v0  ;;  %1909 = vmatprep.subr.mxu1 %v2089_v0 }
  0xb0   :  { %1883 = vmatpush3.msra.mxu0 %v2192_v34  ;;  %1910 = vmatpush3.msra.mxu1 %v2133_v6 }
  0xb1   :  { %1884 = vmatprep.subr.mxu0 %v2089_v0  ;;  %1911 = vmatprep.subr.mxu1 %v2089_v0 }
  0xb2   :  { %1885 = vmatpush3.msra.mxu0 %v2211_v43  ;;  %1912 = vmatpush3.msra.mxu1 %v2135_v10 }
  0xb3   :  { %1886 = vmatprep.subr.mxu0 %v2089_v0  ;;  %1913 = vmatprep.subr.mxu1 %v2089_v0 }
  0xb4   :  { %1887 = vmatpush3.msra.mxu0 %v2223_v47  ;;  %1914 = vmatpush3.msra.mxu1 %v2137_v11 }
  0xb5   :  { %1888 = vmatprep.subr.mxu0 %v2089_v0  ;;  %1915 = vmatprep.subr.mxu1 %v2089_v0 }
  0xb6   :  { %1889 = vmatpush3.msra.mxu0 %v2241_v55  ;;  %1916 = vmatpush3.msra.mxu1 %v2139_v12 }
  0xb7   :  { %1890 = vmatprep.subr.mxu0 %v2089_v0  ;;  %1917 = vmatprep.subr.mxu1 %v2089_v0 }
  0xb8   :  { %1891 = vmatpush3.msra.mxu0 %v2257_v61  ;;  %1918 = vmatpush3.msra.mxu1 %v2148_v17 }
  0xb9   :  { %1892 = vmatprep.subr.mxu0 %v2089_v0  ;;  %1919 = vmatprep.subr.mxu1 %v2089_v0 }
  0xba   :  { %1893 = vmatpush3.msra.mxu0 %v2276_v8  ;;  %1920 = vmatpush3.msra.mxu1 %v2170_v25 }
  0xbb   :  { %1894 = vmatprep.subr.mxu0 %v2089_v0  ;;  %1921 = vmatprep.subr.mxu1 %v2089_v0 }
  0xbc   :  { %1895 = vmatpush3.msra.mxu0 %v2296_v31  ;;  %1922 = vmatpush3.msra.mxu1 %v2176_v28 }
  0xbd   :  { %1896 = vmatprep.subr.mxu0 %v2089_v0  ;;  %1923 = vmatprep.subr.mxu1 %v2089_v0 }
  0xbe   :  { %1897 = vmatpush3.msra.mxu0 %v2312_v41  ;;  %1924 = vmatpush3.msra.mxu1 %v2195_v35 }
  0xbf   :  { %1898 = vmatprep.subr.mxu0 %v2089_v0  ;;  %1925 = vmatprep.subr.mxu1 %v2089_v0 }
  0xc0   :  { %1899 = vmatpush3.msra.mxu0 %v2327_v54  ;;  %1926 = vmatpush3.msra.mxu1 %v2217_v45 }
  0xc1   :  { %1900 = vmatprep.subr.mxu0 %v2089_v0  ;;  %1927 = vmatprep.subr.mxu1 %v2089_v0 }
  0xc2   :  { %1901 = vmatpush3.msra.mxu0 %v2341_v14  ;;  %1902 = vmatprep.mubr.msk.f32.mxu0 %vm2090_vm0, %v2089_v0 }
  0xc3   :  { %1928 = vmatpush3.msra.mxu1 %v2227_v48  ;;  %1903 = vmatmul.mubr.f32.vlgmr.msra.gmra.mxu0 %v2571_v42 }
  0xc4   :  { %1929 = vmatprep.subr.mxu1 %v2089_v0  ;;  %1940 = vmatprep.subr.mxu0 %v2089_v0 }
  0xc5   :  { %1930 = vmatpush3.msra.mxu1 %v2254_v59  ;;  %1941 = vmatpush3.msra.mxu0 %v2162_v22 }
  0xc6   :  { %1931 = vmatprep.subr.mxu1 %v2089_v0  ;;  %1942 = vmatprep.subr.mxu0 %v2089_v0 }
  0xc7   :  { %1932 = vmatpush3.msra.mxu1 %v2264_v63  ;;  %1943 = vmatpush3.msra.mxu0 %v2165_v23 }
  0xc8   :  { %1933 = vmatprep.subr.mxu1 %v2089_v0  ;;  %1944 = vmatprep.subr.mxu0 %v2089_v0 }
  0xc9   :  { %1934 = vmatpush3.msra.mxu1 %v2282_v13  ;;  %1945 = vmatpush3.msra.mxu0 %v2168_v24 }
  0xca   :  { %1935 = vmatprep.subr.mxu1 %v2089_v0  ;;  %1946 = vmatprep.subr.mxu0 %v2089_v0 }
  0xcb   :  { %1936 = vmatpush3.msra.mxu1 %v2300_v32  ;;  %1937 = vmatprep.mubr.msk.f32.mxu1 %vm2090_vm0, %v2089_v0 }
  0xcc   :  { %1947 = vmatpush3.msra.mxu0 %v2174_v27  ;;  %1938 = vmatmul.mubr.f32.vlgmr.msra.gmra.mxu1 %v786_v62 }
  0xcd   :  { %1948 = vmatprep.subr.mxu0 %v2089_v0  ;;  %1975 = vmatprep.subr.mxu1 %v2089_v0 }
  0xce   :  { %1949 = vmatpush3.msra.mxu0 %v2179_v29  ;;  %1976 = vmatpush3.msra.mxu1 %v2129_v4 }
  0xcf   :  { %1950 = vmatprep.subr.mxu0 %v2089_v0  ;;  %1977 = vmatprep.subr.mxu1 %v2089_v0 }
  0xd0   :  { %1951 = vmatpush3.msra.mxu0 %v2205_v40  ;;  %1978 = vmatpush3.msra.mxu1 %v2131_v5 }
  0xd1   :  { %1952 = vmatprep.subr.mxu0 %v2089_v0  ;;  %1979 = vmatprep.subr.mxu1 %v2089_v0 }
  0xd2   :  { %1953 = vmatpush3.msra.mxu0 %v2220_v46  ;;  %1980 = vmatpush3.msra.mxu1 %v2133_v6 }
  0xd3   :  { %1954 = vmatprep.subr.mxu0 %v2089_v0  ;;  %1981 = vmatprep.subr.mxu1 %v2089_v0 }
  0xd4   :  { %1955 = vmatpush3.msra.mxu0 %v2238_v53  ;;  %1982 = vmatpush3.msra.mxu1 %v2135_v10 }
  0xd5   :  { %1956 = vmatprep.subr.mxu0 %v2089_v0  ;;  %1983 = vmatprep.subr.mxu1 %v2089_v0 }
  0xd6   :  { %1957 = vmatpush3.msra.mxu0 %v2248_v57  ;;  %1984 = vmatpush3.msra.mxu1 %v2137_v11 }
  0xd7   :  { %1958 = vmatprep.subr.mxu0 %v2089_v0  ;;  %1985 = vmatprep.subr.mxu1 %v2089_v0 }
  0xd8   :  { %1959 = vmatpush3.msra.mxu0 %v2273_v3  ;;  %1986 = vmatpush3.msra.mxu1 %v2139_v12 }
  0xd9   :  { %1960 = vmatprep.subr.mxu0 %v2089_v0  ;;  %1987 = vmatprep.subr.mxu1 %v2089_v0 }
  0xda   :  { %1961 = vmatpush3.msra.mxu0 %v2289_v19  ;;  %1988 = vmatpush3.msra.mxu1 %v2148_v17  ;;  %v1384_v19 = vld [vmem:[%s2770_s1] ss:$0 sm:$0xff] }
  0xdb   :  { %1962 = vmatprep.subr.mxu0 %v2089_v0  ;;  %1989 = vmatprep.subr.mxu1 %v2089_v0 }
  0xdc   :  { %1963 = vmatpush3.msra.mxu0 %v2309_v39  ;;  %1990 = vmatpush3.msra.mxu1 %v2170_v25 }
  0xdd   :  { %1964 = vmatprep.subr.mxu0 %v2089_v0  ;;  %1991 = vmatprep.subr.mxu1 %v2089_v0 }
  0xde   :  { %1965 = vmatpush3.msra.mxu0 %v2324_v58  ;;  %1992 = vmatpush3.msra.mxu1 %v2176_v28 }
  0xdf   :  { %1966 = vmatprep.subr.mxu0 %v2089_v0  ;;  %1993 = vmatprep.subr.mxu1 %v2089_v0 }
  0xe0   :  { %1967 = vmatpush3.msra.mxu0 %v2338_v52  ;;  %1994 = vmatpush3.msra.mxu1 %v2195_v35 }
  0xe1   :  { %1968 = vmatprep.subr.mxu0 %v2089_v0  ;;  %1995 = vmatprep.subr.mxu1 %v2089_v0 }
  0xe2   :  { %1969 = vmatpush3.msra.mxu0 %v2355_v7  ;;  %1996 = vmatpush3.msra.mxu1 %v2217_v45 }
  0xe3   :  { %1970 = vmatprep.subr.mxu0 %v2089_v0  ;;  %1997 = vmatprep.subr.mxu1 %v2089_v0 }
  0xe4   :  { %1971 = vmatpush3.msra.mxu0 %v2366_v36  ;;  %1972 = vmatprep.mubr.msk.f32.mxu0 %vm2090_vm0, %v2089_v0 }
  0xe5   :  { %1998 = vmatpush3.msra.mxu1 %v2227_v48  ;;  %1973 = vmatmul.mubr.f32.vlgmr.msra.gmra.mxu0 %v2560_v37 }
  0xe6   :  { %1999 = vmatprep.subr.mxu1 %v2089_v0  ;;  %2007 = vmatprep.mubr.msk.f32.mxu1 %vm2090_vm0, %v2089_v0 }
  0xe7   :  { %2000 = vmatpush3.msra.mxu1 %v2254_v59 }
  0xe8   :  { %2001 = vmatprep.subr.mxu1 %v2089_v0 }
  0xe9   :  { %2002 = vmatpush3.msra.mxu1 %v2264_v63 }
  0xea   :  { %2003 = vmatprep.subr.mxu1 %v2089_v0 }
  0xeb   :  { %2004 = vmatpush3.msra.mxu1 %v2282_v13 }
  0xec   :  { %2005 = vmatprep.subr.mxu1 %v2089_v0 }
  0xed   :  { %2006 = vmatpush3.msra.mxu1 %v2300_v32  ;;  %v1385_v32 = vld [vmem:[%s2771_s2] ss:$0 sm:$0xff] }
  0xee   :  { %2008 = vmatmul.mubr.f32.vlgmr.msra.gmra.mxu1 %v2560_v37 }
  0xfd   :  { %v148_v4 = vpop.f32.mrf.mxu0 }
  0xff   :  { %v1624_v5 = vpop.f32.mrf.mxu0 }
 0x104   :  { %v299_v6 = vpop.f32.mrf.mxu1 }
 0x105   :  { %v300_v10 = vadd.f32 %v299_v6, %v148_v4 }
 0x106   :  { %v1659_v11 = vpop.f32.mrf.mxu1 }
 0x11d   :  { %v403_v12 = vpop.f32.mrf.mxu0 }
 0x11e   :  { %v404_v15 = vadd.f32 %v403_v12, %v300_v10 }
 0x11f   :  { %v1694_v16 = vpop.f32.mrf.mxu0 }
 0x126   :  { %v492_v17 = vpop.f32.mrf.mxu1 }
 0x127   :  { %v493_v18 = vadd.f32 %v492_v17, %v404_v15 }
 0x128   :  { %v1729_v20 = vpop.f32.mrf.mxu1 }
 0x13f   :  { %v611_v21 = vpop.f32.mrf.mxu0 }
 0x140   :  { %v612_v22 = vadd.f32 %v611_v21, %v493_v18 }
 0x141   :  { %v1764_v23 = vpop.f32.mrf.mxu0 }
 0x148   :  { %v698_v24 = vpop.f32.mrf.mxu1 }
 0x149   :  { %v699_v0 = vadd.f32 %v698_v24, %v612_v22 }
 0x14a   :  { %v1799_v25 = vpop.f32.mrf.mxu1 }
 0x14b   :  { %v1344_v57 = vmul.f32 %v699_v0, %v699_v0  ;;  %v1349_v13 = vsub.f32 %v2229_v50, %v699_v0 }
 0x162   :  { %v790_v27 = vpop.f32.mrf.mxu0 }
 0x164   :  { %v1834_v28 = vpop.f32.mrf.mxu0 }
 0x16a   :  { %v941_v29 = vpop.f32.mrf.mxu1 }
 0x16b   :  { %v942_v46 = vadd.f32 %v941_v29, %v790_v27 }
 0x16c   :  { %v1869_v30 = vpop.f32.mrf.mxu1 }
 0x183   :  { %v1045_v34 = vpop.f32.mrf.mxu0 }
 0x184   :  { %v1046_v48 = vadd.f32 %v1045_v34, %v942_v46 }
 0x185   :  { %v1904_v35 = vpop.f32.mrf.mxu0 }
 0x18c   :  { %v1134_v40 = vpop.f32.mrf.mxu1 }
 0x18d   :  { %v1135_v51 = vadd.f32 %v1134_v40, %v1046_v48 }
 0x18e   :  { %v1939_v43 = vpop.f32.mrf.mxu1 }
 0x1a5   :  { %v1253_v45 = vpop.f32.mrf.mxu0 }
 0x1a6   :  { %v1254_v53 = vadd.f32 %v1253_v45, %v1135_v51 }
 0x1a7   :  { %v1974_v47 = vpop.f32.mrf.mxu0 }
 0x1ae   :  { %v1340_v55 = vpop.f32.mrf.mxu1 }
 0x1af   :  { %v1341_v59 = vadd.f32 %v1340_v55, %v1254_v53 }
 0x1b0   :  { %v2009_v61 = vpop.f32.mrf.mxu1 }
 0x1b1   :  { %v1345_v63 = vsub.f32 %v1341_v59, %v1344_v57 }
 0x1b3   :  { %v1346_v3 = vmax.f32 %v1345_v63, 0.0 }
 0x1b5   :  { %v1347_v8 = vadd.f32 1e-05, %v1346_v3 }
 0x1b7   :  { %2017 = vrsqrt.f32 %v1347_v8 }
 0x1c4   :  { %v2018_v14 = vpop.eup %2017 }
 0x1c5   :  { %v1350_v31 = vmul.f32 %v2018_v14, %v1349_v13 }
 0x1c7   :  { %v1358_v39 = vmul.f32 %v1384_v19, %v1350_v31 }
 0x1c9   :  { %v1366_v41 = vadd.f32 %v1385_v32, %v1358_v39 }
 0x1cb   :  { %1367 = vst [vmem:[#allocation7] sm:$0xf] %v1366_v41 }
 0x1cc   :  { %2070 = shalt.err (!%p2067_p0)
}
 0x1cd   :  { %1377 = dma.vmem_to_hbm [thread:$0]  %s1375_s30, 64, %s2773_s4, [#allocation4]  }
 0x1ce   :  { %2083 = dma.done.wait [#allocation4], 64  }
 0x1cf   :  { %2084 = vsyncadd [#allocation4], 4294967232 }
 0x1d0   :  { %1381 = vsyncpa [#allocation3], 1 }
 0x1d1   :  { %1382 = vsyncpa [#allocation6], 1 }
 0x1d2   :  { %1383 = vsyncpa [#allocation4], 1 }

</bundles_post_ra>
